<compile_context>
chip_gen: v7x
topology: tpu7x:2x2x1
jax: 0.10.0
libtpu: 0.0.40
codegen_flags: <defaults>
</compile_context>

<pallas_src>
import functools

import jax
import jax.numpy as jnp
from jax.experimental import pallas as pl
from jax.experimental.pallas import tpu as pltpu


def _policy_kernel(x_ref, w1_ref, b1_ref, w2d_ref, b2d_ref, out_ref):
    # x   : (TB, 4)  observations, batch on sublanes
    # w1  : (4, H)   layer-1 weights, hidden on lanes (VMEM-resident)
    # b1  : (1, H)   layer-1 bias row
    # w2d : (1, H)   w2[:, 0] - w2[:, 1]   (logit-difference weights)
    # b2d : (1, 1)   b2[0]    - b2[1]
    # out : (TB, 2)  [p(action 0), p(action 1)] in the module's native layout
    x = x_ref[...]
    w1 = w1_ref[...]

    # Layer 1 on the VPU: K=4 unrolled broadcast-FMAs, bias as accumulator init.
    h = b1_ref[...] + x[:, 0:1] * w1[0:1, :]
    h = h + x[:, 1:2] * w1[1:2, :]
    h = h + x[:, 2:3] * w1[2:3, :]
    h = h + x[:, 3:4] * w1[3:4, :]
    h = jnp.maximum(h, 0.0)                                    # ReLU, (TB, H)

    # Layer 2 + 2-way softmax collapsed to a logit-difference sigmoid.
    # Cross-lane reduction lands on the XLU slot (free w.r.t. the VALU bound).
    d = jnp.sum(h * w2d_ref[...], axis=1, keepdims=True) + b2d_ref[...]  # (TB, 1)
    # exp(-d) overflow for d << 0 gives p0 = 0.0 (correct limit, no NaN).
    p0 = 1.0 / (1.0 + jnp.exp(-d))                             # sigmoid (EUP exp)

    # Two direct sub-stores; avoids a concatenate relayout.
    out_ref[:, 0:1] = p0
    out_ref[:, 1:2] = 1.0 - p0


def _round_up(n, m):
    return ((n + m - 1) // m) * m


def _cdiv(a, b):
    return -(-a // b)


@functools.partial(jax.jit, static_argnames=("tb",))
def nn_policy_forward(x, w1, b1, w2, b2, *, tb=8192):
    """x: (B, 4) f32 observations; returns (B, 2) action probabilities."""
    B, K = x.shape
    H = w1.shape[1]

    # Fold layer 2 + softmax into a logit difference (tiny wrapper-side ops).
    w1f = jnp.asarray(w1, jnp.float32).reshape(K, H)            # (4, H)
    b1r = jnp.asarray(b1, jnp.float32).reshape(1, H)            # (1, H)
    w2f = jnp.asarray(w2, jnp.float32).reshape(H, 2)            # (H, 2)
    b2r = jnp.asarray(b2, jnp.float32).reshape(1, 2)            # works for (2,) or (1,2)
    w2d = (w2f[:, 0] - w2f[:, 1]).reshape(1, H)                 # (1, H)
    b2d = b2r[:, 0:1] - b2r[:, 1:2]                             # (1, 1)

    # Tile selection: pad B only to a multiple of 128, then split into nb
    # tiles of size <= tb.  Guarantee an even nb >= 2 whenever B_pad >= 256 so
    # both v7x TensorCores get work under dimension_semantics=("parallel",).
    tb_max = max(128, _round_up(int(tb), 128))
    B_pad0 = _round_up(B, 128)
    nb = max(1, _cdiv(B_pad0, tb_max))
    if B_pad0 >= 256:
        nb = max(nb, 2)
        if nb % 2:
            nb += 1
    units = B_pad0 // 128
    tb_eff = 128 * _cdiv(units, nb)
    B_pad = nb * tb_eff

    xp = x.astype(jnp.float32)
    if B_pad != B:
        xp = jnp.pad(xp, ((0, B_pad - B), (0, 0)))

    probs = pl.pallas_call(
        _policy_kernel,
        out_shape=jax.ShapeDtypeStruct((B_pad, 2), jnp.float32),
        grid=(nb,),
        in_specs=[
            pl.BlockSpec((tb_eff, K), lambda i: (i, 0)),        # x tile per step
            pl.BlockSpec((K, H), lambda i: (0, 0)),             # w1 : resident
            pl.BlockSpec((1, H), lambda i: (0, 0)),             # b1 : resident
            pl.BlockSpec((1, H), lambda i: (0, 0)),             # w2d: resident
            pl.BlockSpec((1, 1), lambda i: (0, 0)),             # b2d: resident
        ],
        out_specs=pl.BlockSpec((tb_eff, 2), lambda i: (i, 0)),
        compiler_params=pltpu.CompilerParams(
            dimension_semantics=("parallel",)),                 # shards over v7x TCs
    )(xp, w1f, b1r, w2d, b2d)

    return probs[:B]                                            # (B, 2)


def init_params(key, num_hidden=128, obs_dim=4, num_actions=2):
    """Deterministic PyTorch-style (Kaiming-uniform) init of NNPolicy params."""
    k1, k2, k3, k4 = jax.random.split(key, 4)
    bound1 = 1.0 / jnp.sqrt(obs_dim)
    bound2 = 1.0 / jnp.sqrt(num_hidden)
    # stored transposed relative to torch: (in, out)
    w1 = jax.random.uniform(k1, (obs_dim, num_hidden), jnp.float32, -bound1, bound1)
    b1 = jax.random.uniform(k2, (1, num_hidden), jnp.float32, -bound1, bound1)
    w2 = jax.random.uniform(k3, (num_hidden, num_actions), jnp.float32, -bound2, bound2)
    b2 = jax.random.uniform(k4, (1, num_actions), jnp.float32, -bound2, bound2)
    return w1, b1, w2, b2


if __name__ == "__main__":
    key = jax.random.PRNGKey(0)
    k_params, k_x = jax.random.split(key)

    num_hidden = 128
    batch = 8
    w1, b1, w2, b2 = init_params(k_params, num_hidden=num_hidden)
    x = jax.random.normal(k_x, (batch, 4), jnp.float32)   # observations (B, 4)

    probs = nn_policy_forward(x, w1, b1, w2, b2)
    probs = jax.block_until_ready(probs)

    # sanity: reference NNPolicy.forward in plain JAX
    h_ref = jnp.maximum(x @ w1 + b1, 0.0)
    ref = jax.nn.softmax(h_ref @ w2 + b2, axis=1)
    assert probs.shape == (batch, 2)
    assert jnp.allclose(probs, ref, atol=1e-5, rtol=1e-5)
    assert jnp.allclose(jnp.sum(probs, axis=1), 1.0, atol=1e-5)

    # larger, non-multiple batch exercising the multi-step grid path
    xb = jax.random.normal(jax.random.PRNGKey(3), (4097, 4), jnp.float32)
    pb = jax.block_until_ready(nn_policy_forward(xb, w1, b1, w2, b2))
    refb = jax.nn.softmax(jnp.maximum(xb @ w1 + b1, 0.0) @ w2 + b2, axis=1)
    assert pb.shape == (4097, 2)
    assert jnp.allclose(pb, refb, atol=1e-5, rtol=1e-5)

    # TODO(synk): get_probs / sample_action are host-side gather & np.random
    # sampling on top of forward(); they are not part of the kernel.

    print("KERNEL_OK")
</pallas_src>

<mosaic_0001>
module attributes {stable_mosaic.version = 11 : i64} {
  func.func @_policy_kernel(%arg0: i32, %arg1: memref<128x4xf32, #tpu.memory_space<vmem>>, %arg2: memref<4x128xf32, #tpu.memory_space<vmem>>, %arg3: memref<1x128xf32, #tpu.memory_space<vmem>>, %arg4: memref<1x128xf32, #tpu.memory_space<vmem>>, %arg5: memref<1x1xf32, #tpu.memory_space<vmem>>, %arg6: memref<128x2xf32, #tpu.memory_space<vmem>>) attributes {dimension_semantics = [#tpu.dimension_semantics<parallel>], iteration_bounds = array<i64: 1>, scalar_prefetch = 0 : i64, scratch_operands = 0 : i64, tpu.core_type = #tpu.core_type<tc>, window_params = [{transform_indices = @transform_0, window_bounds = array<i64: 128, 4>}, {pipeline_mode = #tpu.pipeline_mode<synchronous>, transform_indices = @transform_1, window_bounds = array<i64: 4, 128>}, {pipeline_mode = #tpu.pipeline_mode<synchronous>, transform_indices = @transform_2, window_bounds = array<i64: 1, 128>}, {pipeline_mode = #tpu.pipeline_mode<synchronous>, transform_indices = @transform_3, window_bounds = array<i64: 1, 128>}, {pipeline_mode = #tpu.pipeline_mode<synchronous>, transform_indices = @transform_4, window_bounds = array<i64: 1, 1>}, {transform_indices = @transform_5, window_bounds = array<i64: 128, 2>}]} {
    %c0 = arith.constant 0 : index
    %c0_0 = arith.constant 0 : index
    %0 = vector.load %arg1[%c0, %c0_0] : memref<128x4xf32, #tpu.memory_space<vmem>>, vector<128x4xf32>
    %c0_1 = arith.constant 0 : index
    %c0_2 = arith.constant 0 : index
    %1 = vector.load %arg2[%c0_1, %c0_2] : memref<4x128xf32, #tpu.memory_space<vmem>>, vector<4x128xf32>
    %c0_3 = arith.constant 0 : index
    %c0_4 = arith.constant 0 : index
    %2 = vector.load %arg3[%c0_3, %c0_4] : memref<1x128xf32, #tpu.memory_space<vmem>>, vector<1x128xf32>
    %3 = vector.extract_strided_slice %0 {offsets = [0, 0], sizes = [128, 1], strides = [1, 1]} : vector<128x4xf32> to vector<128x1xf32>
    %4 = vector.extract_strided_slice %1 {offsets = [0, 0], sizes = [1, 128], strides = [1, 1]} : vector<4x128xf32> to vector<1x128xf32>
    %5 = vector.broadcast %3 : vector<128x1xf32> to vector<128x128xf32>
    %6 = vector.broadcast %4 : vector<1x128xf32> to vector<128x128xf32>
    %7 = arith.mulf %5, %6 : vector<128x128xf32>
    %8 = vector.broadcast %2 : vector<1x128xf32> to vector<128x128xf32>
    %9 = arith.addf %8, %7 : vector<128x128xf32>
    %10 = vector.extract_strided_slice %0 {offsets = [0, 1], sizes = [128, 1], strides = [1, 1]} : vector<128x4xf32> to vector<128x1xf32>
    %11 = vector.extract_strided_slice %1 {offsets = [1, 0], sizes = [1, 128], strides = [1, 1]} : vector<4x128xf32> to vector<1x128xf32>
    %12 = vector.broadcast %10 : vector<128x1xf32> to vector<128x128xf32>
    %13 = vector.broadcast %11 : vector<1x128xf32> to vector<128x128xf32>
    %14 = arith.mulf %12, %13 : vector<128x128xf32>
    %15 = arith.addf %9, %14 : vector<128x128xf32>
    %16 = vector.extract_strided_slice %0 {offsets = [0, 2], sizes = [128, 1], strides = [1, 1]} : vector<128x4xf32> to vector<128x1xf32>
    %17 = vector.extract_strided_slice %1 {offsets = [2, 0], sizes = [1, 128], strides = [1, 1]} : vector<4x128xf32> to vector<1x128xf32>
    %18 = vector.broadcast %16 : vector<128x1xf32> to vector<128x128xf32>
    %19 = vector.broadcast %17 : vector<1x128xf32> to vector<128x128xf32>
    %20 = arith.mulf %18, %19 : vector<128x128xf32>
    %21 = arith.addf %15, %20 : vector<128x128xf32>
    %22 = vector.extract_strided_slice %0 {offsets = [0, 3], sizes = [128, 1], strides = [1, 1]} : vector<128x4xf32> to vector<128x1xf32>
    %23 = vector.extract_strided_slice %1 {offsets = [3, 0], sizes = [1, 128], strides = [1, 1]} : vector<4x128xf32> to vector<1x128xf32>
    %24 = vector.broadcast %22 : vector<128x1xf32> to vector<128x128xf32>
    %25 = vector.broadcast %23 : vector<1x128xf32> to vector<128x128xf32>
    %26 = arith.mulf %24, %25 : vector<128x128xf32>
    %27 = arith.addf %21, %26 : vector<128x128xf32>
    %cst = arith.constant 0.000000e+00 : f32
    %28 = vector.broadcast %cst : f32 to vector<128x128xf32>
    %29 = arith.maximumf %27, %28 : vector<128x128xf32>
    %c0_5 = arith.constant 0 : index
    %c0_6 = arith.constant 0 : index
    %30 = vector.load %arg4[%c0_5, %c0_6] : memref<1x128xf32, #tpu.memory_space<vmem>>, vector<1x128xf32>
    %31 = vector.broadcast %30 : vector<1x128xf32> to vector<128x128xf32>
    %32 = arith.mulf %29, %31 : vector<128x128xf32>
    %cst_7 = arith.constant dense<0.000000e+00> : vector<128xf32>
    %33 = vector.multi_reduction <add>, %32, %cst_7 [1] : vector<128x128xf32> to vector<128xf32>
    %34 = vector.shape_cast %33 : vector<128xf32> to vector<128x1xf32>
    %c0_8 = arith.constant 0 : index
    %c0_9 = arith.constant 0 : index
    %35 = vector.load %arg5[%c0_8, %c0_9] : memref<1x1xf32, #tpu.memory_space<vmem>>, vector<1x1xf32>
    %36 = vector.broadcast %35 : vector<1x1xf32> to vector<128x1xf32>
    %37 = arith.addf %34, %36 : vector<128x1xf32>
    %cst_10 = arith.constant 0.000000e+00 : f32
    %38 = vector.broadcast %cst_10 : f32 to vector<128x1xf32>
    %39 = arith.subf %38, %37 : vector<128x1xf32>
    %40 = math.exp %39 : vector<128x1xf32>
    %cst_11 = arith.constant 1.000000e+00 : f32
    %41 = vector.broadcast %cst_11 : f32 to vector<128x1xf32>
    %42 = arith.addf %41, %40 : vector<128x1xf32>
    %cst_12 = arith.constant 1.000000e+00 : f32
    %43 = vector.broadcast %cst_12 : f32 to vector<128x1xf32>
    %44 = arith.divf %43, %42 : vector<128x1xf32>
    %c0_13 = arith.constant 0 : index
    %c0_14 = arith.constant 0 : index
    %45 = vector.load %arg6[%c0_13, %c0_14] : memref<128x2xf32, #tpu.memory_space<vmem>>, vector<128x1xf32>
    tpu.vector_store %arg6[%c0_13, %c0_14], %44 {strides = array<i32>} : memref<128x2xf32, #tpu.memory_space<vmem>>, vector<128x1xf32>,
    %cst_15 = arith.constant 1.000000e+00 : f32
    %46 = vector.broadcast %cst_15 : f32 to vector<128x1xf32>
    %47 = arith.subf %46, %44 : vector<128x1xf32>
    %c0_16 = arith.constant 0 : index
    %c1 = arith.constant 1 : index
    %48 = vector.load %arg6[%c0_16, %c1] : memref<128x2xf32, #tpu.memory_space<vmem>>, vector<128x1xf32>
    tpu.vector_store %arg6[%c0_16, %c1], %47 {strides = array<i32>} : memref<128x2xf32, #tpu.memory_space<vmem>>, vector<128x1xf32>,
    return
  }
  func.func @transform_0(%arg0: i32) -> (i32, i32) {
    %c0_i32 = arith.constant 0 : i32
    %c0_i32_0 = arith.constant 0 : i32
    return %arg0, %c0_i32 : i32, i32
  }
  func.func @transform_1(%arg0: i32) -> (i32, i32) {
    %c0_i32 = arith.constant 0 : i32
    %c0_i32_0 = arith.constant 0 : i32
    %c0_i32_1 = arith.constant 0 : i32
    return %c0_i32, %c0_i32_0 : i32, i32
  }
  func.func @transform_2(%arg0: i32) -> (i32, i32) {
    %c0_i32 = arith.constant 0 : i32
    %c0_i32_0 = arith.constant 0 : i32
    %c0_i32_1 = arith.constant 0 : i32
    return %c0_i32, %c0_i32_0 : i32, i32
  }
  func.func @transform_3(%arg0: i32) -> (i32, i32) {
    %c0_i32 = arith.constant 0 : i32
    %c0_i32_0 = arith.constant 0 : i32
    %c0_i32_1 = arith.constant 0 : i32
    return %c0_i32, %c0_i32_0 : i32, i32
  }
  func.func @transform_4(%arg0: i32) -> (i32, i32) {
    %c0_i32 = arith.constant 0 : i32
    %c0_i32_0 = arith.constant 0 : i32
    %c0_i32_1 = arith.constant 0 : i32
    return %c0_i32, %c0_i32_0 : i32, i32
  }
  func.func @transform_5(%arg0: i32) -> (i32, i32) {
    %c0_i32 = arith.constant 0 : i32
    %c0_i32_0 = arith.constant 0 : i32
    return %arg0, %c0_i32 : i32, i32
  }
}

</mosaic_0001>

<bundles_post_ra>
// kernel: nn_policy_forward.1
= control target key start
LH: loop header
LB: loop body
LE: loop exit
PB: predicated region body
PF: predicated region fallthrough
CT: control target
= control target key end

     0   :  { %v850_v0 = vmov 0   ;;  %v851_v17 = vmov 1   ;;  %v852_v18 = vmov 2   ;;  %v853_v19 = vmov 3   ;;  %s854_s30 = smov 1   ;;  %s1389_s0 = inlined_call_operand.vmem [shape: f32[128,4], index: 0, kind: input, shape index: {}]   ;;  %s1390_s4 = inlined_call_operand.<no memory space> [shape: f32[1,1], index: 4, kind: input, shape index: {}]   ;;  %s1391_s1 = inlined_call_operand.vmem [shape: f32[4,128], index: 1, kind: input, shape index: {}]   ;;  %s1392_s2 = inlined_call_operand.vmem [shape: f32[1,128], index: 2, kind: input, shape index: {}]   ;;  %s1393_s3 = inlined_call_operand.vmem [shape: f32[1,128], index: 3, kind: input, shape index: {}]   ;;  %s1394_s5 = inlined_call_operand.vmem [shape: f32[128,2], index: 5, kind: output, shape index: {}]  }
   0x1   :  { %779 = vset.pattern.permute.xlu1 %v850_v0  ;;  %778 = vset.pattern.permute.xlu0 %v850_v0  ;;  %v888_v1 = vld [vmem:[%s1389_s0 + $0x10] sm:$0xff]  ;;  %v893_v2 = vld [vmem:[%s1389_s0] sm:$0xff]  ;;  %v900_v3 = vld [vmem:[%s1389_s0 + $0x18] sm:$0xff]  ;;  %v10_v28 = vstv %s1390_s4  ;;  %v120_v29 = vlaneseq  ;;  %vm652_vm0 = vcmask 7168   ;;  %vm749_vm1 = vcmask 15368  }
   0x2   :  { %52 = vperm.xlu1 %779, %v888_v1   ;;  %42 = vperm.xlu0 %778, %v893_v2   ;;  %v905_v4 = vld [vmem:[%s1389_s0 + $0x8] sm:$0xff]  ;;  %v917_v6 = vld [vmem:[%s1389_s0 + $0x20] sm:$0xff]  ;;  %v924_v7 = vld [vmem:[%s1389_s0 + $0x38] sm:$0xff]  ;;  %11 = vst [vmem:[#allocation2] sm:$0x1] %v10_v28 }
   0x3   :  { %v912_v5 = vld [vmem:[%s1389_s0 + $0x28] sm:$0xff]  ;;  %v929_v8 = vld [vmem:[%s1389_s0 + $0x30] sm:$0xff]  ;;  %v941_v10 = vld [vmem:[%s1389_s0 + $0x40] sm:$0xff]  ;;  %v1012_v32 = vshrl.u32 %v120_v29, 7 }
   0x4   :  { %v936_v9 = vld [vmem:[%s1389_s0 + $0x48] sm:$0xff]  ;;  %v33_v11 = vld [vmem:[%s1389_s0 + $0x58] sm:$0xff]  ;;  %v951_v12 = vld [vmem:[%s1389_s0 + $0x50] sm:$0xff] }
   0x5   :  { %v35_v13 = vld [vmem:[%s1389_s0 + $0x68] sm:$0xff]  ;;  %v34_v14 = vld [vmem:[%s1389_s0 + $0x60] sm:$0xff]  ;;  %v37_v15 = vld [vmem:[%s1389_s0 + $0x78] sm:$0xff]  ;;  %v122_v35 = vsub.s32 0, %v1012_v32  ;;  %v228_v39 = vsub.s32 1, %v1012_v32 }
   0x6   :  { %57 = vperm.xlu1 %779, %v900_v3   ;;  %47 = vperm.xlu0 %778, %v905_v4   ;;  %v36_v16 = vld [vmem:[%s1389_s0 + $0x70] sm:$0xff]  ;;  %v1022_v38 = vld [vmem:[%s1391_s1] sm:$0xf] }
   0x7   :  { %v1026_v40 = vrot.slane %v1022_v38, %v122_v35  ;;  %v1032_v44 = vrot.slane %v1022_v38, %v228_v39  ;;  %v1037_v45 = vld [vmem:[%s1392_s2] ss:$0 sm:$0xff] }
   0xa   :  { %67 = vperm.xlu1 %779, %v912_v5   ;;  %62 = vperm.xlu0 %778, %v917_v6  }
   0xe   :  { %77 = vperm.xlu1 %779, %v924_v7   ;;  %72 = vperm.xlu0 %778, %v929_v8  }
  0x12   :  { %87 = vperm.xlu1 %779, %v936_v9   ;;  %82 = vperm.xlu0 %778, %v941_v10  }
  0x16   :  { %97 = vperm.xlu1 %779, %v33_v11   ;;  %92 = vperm.xlu0 %778, %v951_v12  }
  0x1a   :  { %107 = vperm.xlu1 %779, %v35_v13   ;;  %102 = vperm.xlu0 %778, %v34_v14  }
  0x1e   :  { %117 = vperm.xlu1 %779, %v37_v15   ;;  %112 = vperm.xlu0 %778, %v36_v16  }
  0x22   :  { %781 = vset.pattern.permute.xlu1 %v851_v17  ;;  %780 = vset.pattern.permute.xlu0 %v851_v17 }
  0x23   :  { %167 = vperm.xlu1 %781, %v905_v4   ;;  %163 = vperm.xlu0 %780, %v893_v2  }
  0x27   :  { %171 = vperm.xlu1 %781, %v888_v1   ;;  %175 = vperm.xlu0 %780, %v900_v3  }
  0x2b   :  { %179 = vperm.xlu1 %781, %v917_v6   ;;  %183 = vperm.xlu0 %780, %v912_v5  }
  0x2f   :  { %187 = vperm.xlu1 %781, %v929_v8   ;;  %191 = vperm.xlu0 %780, %v924_v7  }
  0x33   :  { %195 = vperm.xlu1 %781, %v941_v10   ;;  %199 = vperm.xlu0 %780, %v936_v9  }
  0x37   :  { %203 = vperm.xlu1 %781, %v951_v12   ;;  %207 = vperm.xlu0 %780, %v33_v11  }
  0x3b   :  { %211 = vperm.xlu1 %781, %v34_v14   ;;  %215 = vperm.xlu0 %780, %v35_v13  }
  0x3f   :  { %219 = vperm.xlu1 %781, %v36_v16   ;;  %223 = vperm.xlu0 %780, %v37_v15  }
  0x43   :  { %782 = vset.pattern.permute.xlu1 %v852_v18  ;;  %783 = vset.pattern.permute.xlu0 %v852_v18 }
  0x44   :  { %263 = vperm.xlu1 %782, %v893_v2   ;;  %267 = vperm.xlu0 %783, %v905_v4  }
  0x48   :  { %271 = vperm.xlu1 %782, %v888_v1   ;;  %279 = vperm.xlu0 %783, %v917_v6  }
  0x4c   :  { %275 = vperm.xlu1 %782, %v900_v3   ;;  %287 = vperm.xlu0 %783, %v929_v8  }
  0x50   :  { %283 = vperm.xlu1 %782, %v912_v5   ;;  %295 = vperm.xlu0 %783, %v941_v10  }
  0x54   :  { %291 = vperm.xlu1 %782, %v924_v7   ;;  %303 = vperm.xlu0 %783, %v951_v12  }
  0x58   :  { %299 = vperm.xlu1 %782, %v936_v9   ;;  %311 = vperm.xlu0 %783, %v34_v14  }
  0x5c   :  { %307 = vperm.xlu1 %782, %v33_v11   ;;  %319 = vperm.xlu0 %783, %v36_v16  }
  0x60   :  { %315 = vperm.xlu1 %782, %v35_v13   ;;  %784 = vset.pattern.permute.xlu0 %v853_v19 }
  0x61   :  { %363 = vperm.xlu0 %784, %v893_v2  }
  0x64   :  { %323 = vperm.xlu1 %782, %v37_v15  }
  0x65   :  { %375 = vperm.xlu0 %784, %v900_v3  }
  0x68   :  { %785 = vset.pattern.permute.xlu1 %v853_v19 }
  0x69   :  { %367 = vperm.xlu1 %785, %v905_v4   ;;  %383 = vperm.xlu0 %784, %v912_v5  }
  0x6d   :  { %371 = vperm.xlu1 %785, %v888_v1   ;;  %391 = vperm.xlu0 %784, %v924_v7  }
  0x71   :  { %379 = vperm.xlu1 %785, %v917_v6   ;;  %399 = vperm.xlu0 %784, %v936_v9  }
  0x75   :  { %387 = vperm.xlu1 %785, %v929_v8   ;;  %407 = vperm.xlu0 %784, %v33_v11  }
  0x79   :  { %395 = vperm.xlu1 %785, %v941_v10   ;;  %415 = vperm.xlu0 %784, %v35_v13  }
  0x7d   :  { %403 = vperm.xlu1 %785, %v951_v12   ;;  %423 = vperm.xlu0 %784, %v37_v15  }
  0x81   :  { %v53_v20 = vpop.permute.xlu1 %52  ;;  %411 = vperm.xlu1 %785, %v34_v14   ;;  %v999_v21 = vpop.permute.xlu0 %42 }
  0x82   :  { %v126_v48 = vmul.f32 %v1026_v40, %v53_v20 }
  0x84   :  { %v148_v54 = vadd.f32 %v1037_v45, %v126_v48 }
  0x85   :  { %v1001_v22 = vpop.permute.xlu1 %57  ;;  %419 = vperm.xlu1 %785, %v36_v16   ;;  %v48_v23 = vpop.permute.xlu0 %47 }
  0x86   :  { %v125_v43 = vmul.f32 %v1026_v40, %v48_v23 }
  0x88   :  { %v147_v49 = vadd.f32 %v1037_v45, %v125_v43 }
  0x89   :  { %v1003_v24 = vpop.permute.xlu1 %67  ;;  %v63_v25 = vpop.permute.xlu0 %62 }
  0x8a   :  { %v128_v55 = vmul.f32 %v1026_v40, %v63_v25 }
  0x8c   :  { %v150_v60 = vadd.f32 %v1037_v45, %v128_v55  ;;  %v328_v55 = vsub.s32 2, %v1012_v32 }
  0x8d   :  { %v1005_v26 = vpop.permute.xlu1 %77  ;;  %v73_v27 = vpop.permute.xlu0 %72 }
  0x8e   :  { %v130_v61 = vmul.f32 %v1026_v40, %v73_v27 }
  0x90   :  { %v152_v2 = vadd.f32 %v1037_v45, %v130_v61  ;;  %v1106_v61 = vrot.slane %v1022_v38, %v328_v55 }
  0x91   :  { %v1010_v30 = vpop.permute.xlu1 %87  ;;  %v83_v31 = vpop.permute.xlu0 %82 }
  0x92   :  { %v132_v3 = vmul.f32 %v1026_v40, %v83_v31 }
  0x94   :  { %v154_v8 = vadd.f32 %v1037_v45, %v132_v3 }
  0x95   :  { %v1014_v33 = vpop.permute.xlu1 %97  ;;  %v93_v34 = vpop.permute.xlu0 %92 }
  0x96   :  { %v134_v9 = vmul.f32 %v1026_v40, %v93_v34 }
  0x98   :  { %v156_v14 = vadd.f32 %v1037_v45, %v134_v9 }
  0x99   :  { %v1017_v36 = vpop.permute.xlu1 %107  ;;  %v103_v37 = vpop.permute.xlu0 %102 }
  0x9a   :  { %v136_v15 = vmul.f32 %v1026_v40, %v103_v37 }
  0x9c   :  { %v158_v20 = vadd.f32 %v1037_v45, %v136_v15 }
  0x9d   :  { %v1028_v41 = vpop.permute.xlu1 %117  ;;  %v113_v42 = vpop.permute.xlu0 %112 }
  0x9e   :  { %v138_v23 = vmul.f32 %v1026_v40, %v113_v42 }
  0xa0   :  { %v160_v31 = vadd.f32 %v1037_v45, %v138_v23 }
  0xa2   :  { %v168_v46 = vpop.permute.xlu1 %167  ;;  %v164_v47 = vpop.permute.xlu0 %163 }
  0xa3   :  { %v231_v50 = vmul.f32 %v1032_v44, %v168_v46 }
  0xa5   :  { %v1042_v51 = vadd.f32 %v231_v50, %v147_v49 }
  0xa6   :  { %v172_v52 = vpop.permute.xlu1 %171  ;;  %v1044_v53 = vpop.permute.xlu0 %175 }
  0xa7   :  { %v232_v56 = vmul.f32 %v1032_v44, %v172_v52 }
  0xa9   :  { %v1049_v57 = vadd.f32 %v232_v56, %v148_v54 }
  0xaa   :  { %v180_v58 = vpop.permute.xlu1 %179  ;;  %v1051_v59 = vpop.permute.xlu0 %183 }
  0xab   :  { %v234_v62 = vmul.f32 %v1032_v44, %v180_v58 }
  0xad   :  { %v1056_v63 = vadd.f32 %v234_v62, %v150_v60  ;;  %v124_v60 = vmul.f32 %v1026_v40, %v999_v21  ;;  %v428_v62 = vsub.s32 3, %v1012_v32  ;;  %v233_v32 = vmul.f32 %v1032_v44, %v1044_v53 }
  0xae   :  { %v188_v0 = vpop.permute.xlu1 %187  ;;  %v1058_v1 = vpop.permute.xlu0 %191 }
  0xaf   :  { %v236_v4 = vmul.f32 %v1032_v44, %v188_v0  ;;  %v230_v0 = vmul.f32 %v1032_v44, %v164_v47  ;;  %v1119_v21 = vrot.slane %v1022_v38, %v428_v62  ;;  %v129_v47 = vmul.f32 %v1026_v40, %v1003_v24 }
  0xb0   :  { %v235_v38 = vmul.f32 %v1032_v44, %v1051_v59  ;;  %v131_v24 = vmul.f32 %v1026_v40, %v1005_v26  ;;  %v237_v55 = vmul.f32 %v1032_v44, %v1058_v1  ;;  %v133_v26 = vmul.f32 %v1026_v40, %v1010_v30 }
  0xb1   :  { %v1063_v5 = vadd.f32 %v236_v4, %v152_v2  ;;  %v146_v4 = vadd.f32 %v1037_v45, %v124_v60  ;;  %v151_v53 = vadd.f32 %v1037_v45, %v129_v47 }
  0xb2   :  { %v196_v6 = vpop.permute.xlu1 %195  ;;  %v1065_v7 = vpop.permute.xlu0 %199 }
  0xb3   :  { %v238_v10 = vmul.f32 %v1032_v44, %v196_v6  ;;  %v127_v6 = vmul.f32 %v1026_v40, %v1001_v22  ;;  %v246_v9 = vadd.f32 %v230_v0, %v146_v4  ;;  %v251_v60 = vadd.f32 %v235_v38, %v151_v53 }
  0xb4   :  { %v153_v0 = vadd.f32 %v1037_v45, %v131_v24 }
  0xb5   :  { %v1070_v11 = vadd.f32 %v238_v10, %v154_v8 }
  0xb6   :  { %v204_v12 = vpop.permute.xlu1 %203  ;;  %v1072_v13 = vpop.permute.xlu0 %207 }
  0xb7   :  { %v240_v16 = vmul.f32 %v1032_v44, %v204_v12 }
  0xb9   :  { %v1077_v17 = vadd.f32 %v240_v16, %v156_v14  ;;  %v149_v14 = vadd.f32 %v1037_v45, %v127_v6 }
  0xba   :  { %v212_v18 = vpop.permute.xlu1 %211  ;;  %v1079_v19 = vpop.permute.xlu0 %215 }
  0xbb   :  { %v242_v25 = vmul.f32 %v1032_v44, %v212_v18  ;;  %v249_v18 = vadd.f32 %v233_v32, %v149_v14  ;;  %v253_v14 = vadd.f32 %v237_v55, %v153_v0 }
  0xbd   :  { %v1084_v27 = vadd.f32 %v242_v25, %v158_v20 }
  0xbe   :  { %v220_v28 = vpop.permute.xlu1 %219  ;;  %v1086_v29 = vpop.permute.xlu0 %223 }
  0xbf   :  { %v244_v34 = vmul.f32 %v1032_v44, %v220_v28 }
  0xc1   :  { %v1090_v35 = vadd.f32 %v244_v34, %v160_v31  ;;  %v1141_v31 = vld [vmem:[%s1393_s3] ss:$0 sm:$0xff] }
  0xc3   :  { %v264_v37 = vpop.permute.xlu1 %263  ;;  %v268_v39 = vpop.permute.xlu0 %267 }
  0xc4   :  { %v330_v8 = vmul.f32 %v1106_v61, %v264_v37  ;;  %v331_v25 = vmul.f32 %v1106_v61, %v268_v39 }
  0xc6   :  { %v346_v15 = vadd.f32 %v330_v8, %v246_v9  ;;  %v347_v4 = vadd.f32 %v331_v25, %v1042_v51  ;;  %v239_v51 = vmul.f32 %v1032_v44, %v1065_v7 }
  0xc7   :  { %v272_v43 = vpop.permute.xlu1 %271  ;;  %v1092_v46 = vpop.permute.xlu0 %279 }
  0xc8   :  { %v332_v6 = vmul.f32 %v1106_v61, %v272_v43  ;;  %v155_v43 = vadd.f32 %v1037_v45, %v133_v26 }
  0xcb   :  { %v276_v48 = vpop.permute.xlu1 %275  ;;  %v1094_v42 = vpop.permute.xlu0 %287 }
  0xcc   :  { %v333_v22 = vmul.f32 %v1106_v61, %v276_v48 }
  0xce   :  { %v349_v34 = vadd.f32 %v333_v22, %v249_v18  ;;  %v334_v18 = vmul.f32 %v1106_v61, %v1092_v46  ;;  %v241_v46 = vmul.f32 %v1032_v44, %v1072_v13 }
  0xcf   :  { %v284_v49 = vpop.permute.xlu1 %283  ;;  %v1096_v50 = vpop.permute.xlu0 %295 }
  0xd0   :  { %v335_v37 = vmul.f32 %v1106_v61, %v284_v49  ;;  %v350_v26 = vadd.f32 %v334_v18, %v1056_v63  ;;  %v139_v63 = vmul.f32 %v1026_v40, %v1028_v41 }
  0xd2   :  { %v351_v32 = vadd.f32 %v335_v37, %v251_v60  ;;  %v255_v37 = vadd.f32 %v239_v51, %v155_v43  ;;  %v336_v60 = vmul.f32 %v1106_v61, %v1094_v42 }
  0xd3   :  { %v292_v52 = vpop.permute.xlu1 %291  ;;  %v1098_v54 = vpop.permute.xlu0 %303 }
  0xd4   :  { %v337_v49 = vmul.f32 %v1106_v61, %v292_v52 }
  0xd6   :  { %v353_v38 = vadd.f32 %v337_v49, %v253_v14 }
  0xd7   :  { %v300_v56 = vpop.permute.xlu1 %299  ;;  %v1101_v58 = vpop.permute.xlu0 %311 }
  0xdb   :  { %v1110_v2 = vpop.permute.xlu1 %307  ;;  %v1112_v3 = vpop.permute.xlu0 %319 }
  0xdf   :  { %v1123_v10 = vpop.permute.xlu1 %315 }
  0xe0   :  { %v364_v12 = vpop.permute.xlu0 %363  ;;  %v343_v51 = vmul.f32 %v1106_v61, %v1123_v10 }
  0xe1   :  { %v430_v16 = vmul.f32 %v1119_v21, %v364_v12  ;;  %v135_v12 = vmul.f32 %v1026_v40, %v1014_v33 }
  0xe3   :  { %v446_v20 = vadd.f32 %v430_v16, %v346_v15  ;;  %v1132_v23 = vpop.permute.xlu1 %323  ;;  %v348_v16 = vadd.f32 %v332_v6, %v1049_v57  ;;  %v137_v57 = vmul.f32 %v1026_v40, %v1017_v36 }
  0xe4   :  { %v376_v28 = vpop.permute.xlu0 %375 }
  0xe5   :  { %v462_v59 = vmax.f32 %v446_v20, 0.0  ;;  %v433_v48 = vmul.f32 %v1119_v21, %v376_v28  ;;  %v339_v20 = vmul.f32 %v1106_v61, %v300_v56 }
  0xe7   :  { %v449_v39 = vadd.f32 %v433_v48, %v349_v34  ;;  %v485_v62 = vmul.f32 %v1141_v31, %v462_v59  ;;  %v157_v34 = vadd.f32 %v1037_v45, %v135_v12  ;;  %v338_v12 = vmul.f32 %v1106_v61, %v1096_v50 }
  0xe8   :  { %v368_v8 = vpop.permute.xlu1 %367  ;;  %v384_v9 = vpop.permute.xlu0 %383  ;;  %v245_v50 = vmul.f32 %v1032_v44, %v1086_v29 }
  0xe9   :  { %v465_v47 = vmax.f32 %v449_v39, 0.0  ;;  %v431_v1 = vmul.f32 %v1119_v21, %v368_v8  ;;  %v435_v30 = vmul.f32 %v1119_v21, %v384_v9  ;;  %501 = vadd.xlane.f32.xlu1 %v485_v62  ;;  %v355_v39 = vadd.f32 %v339_v20, %v255_v37 }
  0xea   :  { %v341_v62 = vmul.f32 %v1106_v61, %v1110_v2  ;;  %v159_v8 = vadd.f32 %v1037_v45, %v137_v57  ;;  %v257_v42 = vadd.f32 %v241_v46, %v157_v34  ;;  %v243_v9 = vmul.f32 %v1032_v44, %v1079_v19 }
  0xeb   :  { %v447_v15 = vadd.f32 %v431_v1, %v347_v4  ;;  %v451_v52 = vadd.f32 %v435_v30, %v351_v32  ;;  %v488_v22 = vmul.f32 %v1141_v31, %v465_v47  ;;  %v352_v30 = vadd.f32 %v336_v60, %v1063_v5 }
  0xec   :  { %v372_v53 = vpop.permute.xlu1 %371  ;;  %v392_v33 = vpop.permute.xlu0 %391  ;;  %v357_v14 = vadd.f32 %v341_v62, %v257_v42  ;;  %v259_v5 = vadd.f32 %v243_v9, %v159_v8  ;;  %v354_v20 = vadd.f32 %v338_v12, %v1070_v11  ;;  %v1227_v12 = vld [vmem:[#allocation2] ss:$0 sm:$0xff] }
  0xed   :  { %v463_v24 = vmax.f32 %v447_v15, 0.0  ;;  %v467_v25 = vmax.f32 %v451_v52, 0.0  ;;  %v432_v7 = vmul.f32 %v1119_v21, %v372_v53  ;;  %v437_v28 = vmul.f32 %v1119_v21, %v392_v33  ;;  %507 = vadd.xlane.f32.xlu1 %v488_v22 }
  0xee   :  { %v161_v22 = vadd.f32 %v1037_v45, %v139_v63  ;;  %v340_v53 = vmul.f32 %v1106_v61, %v1098_v54  ;;  %v359_v33 = vadd.f32 %v343_v51, %v259_v5 }
  0xef   :  { %v448_v59 = vadd.f32 %v432_v7, %v348_v16  ;;  %v453_v56 = vadd.f32 %v437_v28, %v353_v38  ;;  %v486_v48 = vmul.f32 %v1141_v31, %v463_v24  ;;  %v490_v55 = vmul.f32 %v1141_v31, %v467_v25 }
  0xf0   :  { %v380_v36 = vpop.permute.xlu1 %379  ;;  %v400_v0 = vpop.permute.xlu0 %399  ;;  %v345_v24 = vmul.f32 %v1106_v61, %v1132_v23  ;;  %v261_v34 = vadd.f32 %v245_v50, %v161_v22  ;;  %v356_v46 = vadd.f32 %v340_v53, %v1077_v17  ;;  %v342_v23 = vmul.f32 %v1106_v61, %v1101_v58 }
  0xf1   :  { %v464_v4 = vmax.f32 %v448_v59, 0.0  ;;  %v469_v6 = vmax.f32 %v453_v56, 0.0  ;;  %v434_v13 = vmul.f32 %v1119_v21, %v380_v36  ;;  %v439_v49 = vmul.f32 %v1119_v21, %v400_v0  ;;  %503 = vadd.xlane.f32.xlu0 %v486_v48  ;;  %511 = vadd.xlane.f32.xlu1 %v490_v55 }
  0xf2   :  { %v361_v59 = vadd.f32 %v345_v24, %v261_v34 }
  0xf3   :  { %v450_v2 = vadd.f32 %v434_v13, %v350_v26  ;;  %v455_v32 = vadd.f32 %v439_v49, %v355_v39  ;;  %v487_v47 = vmul.f32 %v1141_v31, %v464_v4  ;;  %v492_v1 = vmul.f32 %v1141_v31, %v469_v6 }
  0xf4   :  { %v388_v40 = vpop.permute.xlu1 %387  ;;  %v408_v41 = vpop.permute.xlu0 %407  ;;  %v358_v4 = vadd.f32 %v342_v23, %v1084_v27  ;;  %v344_v6 = vmul.f32 %v1106_v61, %v1112_v3 }
  0xf5   :  { %v466_v43 = vmax.f32 %v450_v2, 0.0  ;;  %v471_v15 = vmax.f32 %v455_v32, 0.0  ;;  %v436_v19 = vmul.f32 %v1119_v21, %v388_v40  ;;  %v441_v52 = vmul.f32 %v1119_v21, %v408_v41  ;;  %505 = vadd.xlane.f32.xlu0 %v487_v47  ;;  %515 = vadd.xlane.f32.xlu1 %v492_v1 }
  0xf6   :  { %v360_v32 = vadd.f32 %v344_v6, %v1090_v35 }
  0xf7   :  { %v452_v16 = vadd.f32 %v436_v19, %v352_v30  ;;  %v457_v18 = vadd.f32 %v441_v52, %v357_v14  ;;  %v489_v10 = vmul.f32 %v1141_v31, %v466_v43  ;;  %v494_v38 = vmul.f32 %v1141_v31, %v471_v15 }
  0xf8   :  { %v396_v45 = vpop.permute.xlu1 %395  ;;  %v416_v25 = vpop.permute.xlu0 %415 }
  0xf9   :  { %v468_v7 = vmax.f32 %v452_v16, 0.0  ;;  %v473_v28 = vmax.f32 %v457_v18, 0.0  ;;  %v438_v44 = vmul.f32 %v1119_v21, %v396_v45  ;;  %v443_v29 = vmul.f32 %v1119_v21, %v416_v25  ;;  %509 = vadd.xlane.f32.xlu0 %v489_v10  ;;  %519 = vadd.xlane.f32.xlu1 %v494_v38 }
  0xfb   :  { %v454_v57 = vadd.f32 %v438_v44, %v354_v20  ;;  %v459_v11 = vadd.f32 %v443_v29, %v359_v33  ;;  %v491_v37 = vmul.f32 %v1141_v31, %v468_v7  ;;  %v496_v54 = vmul.f32 %v1141_v31, %v473_v28 }
  0xfc   :  { %v404_v56 = vpop.permute.xlu1 %403  ;;  %v424_v48 = vpop.permute.xlu0 %423 }
  0xfd   :  { %v470_v55 = vmax.f32 %v454_v57, 0.0  ;;  %v475_v26 = vmax.f32 %v459_v11, 0.0  ;;  %v440_v60 = vmul.f32 %v1119_v21, %v404_v56  ;;  %v445_v39 = vmul.f32 %v1119_v21, %v424_v48  ;;  %513 = vadd.xlane.f32.xlu0 %v491_v37  ;;  %523 = vadd.xlane.f32.xlu1 %v496_v54 }
  0xff   :  { %v456_v62 = vadd.f32 %v440_v60, %v356_v46  ;;  %v461_v36 = vadd.f32 %v445_v39, %v361_v59  ;;  %v493_v0 = vmul.f32 %v1141_v31, %v470_v55  ;;  %v498_v17 = vmul.f32 %v1141_v31, %v475_v26 }
 0x100   :  { %v412_v58 = vpop.permute.xlu1 %411 }
 0x101   :  { %v472_v13 = vmax.f32 %v456_v62, 0.0  ;;  %v477_v49 = vmax.f32 %v461_v36, 0.0  ;;  %v442_v8 = vmul.f32 %v1119_v21, %v412_v58  ;;  %517 = vadd.xlane.f32.xlu0 %v493_v0  ;;  %527 = vadd.xlane.f32.xlu1 %v498_v17 }
 0x103   :  { %v458_v63 = vadd.f32 %v442_v8, %v358_v4  ;;  %v495_v42 = vmul.f32 %v1141_v31, %v472_v13  ;;  %v500_v9 = vmul.f32 %v1141_v31, %v477_v49 }
 0x104   :  { %v420_v2 = vpop.permute.xlu1 %419 }
 0x105   :  { %v474_v47 = vmax.f32 %v458_v63, 0.0  ;;  %v444_v27 = vmul.f32 %v1119_v21, %v420_v2  ;;  %521 = vadd.xlane.f32.xlu0 %v495_v42  ;;  %531 = vadd.xlane.f32.xlu1 %v500_v9 }
 0x107   :  { %v460_v61 = vadd.f32 %v444_v27, %v360_v32  ;;  %v497_v3 = vmul.f32 %v1141_v31, %v474_v47 }
 0x109   :  { %v476_v1 = vmax.f32 %v460_v61, 0.0  ;;  %525 = vadd.xlane.f32.xlu0 %v497_v3 }
 0x10b   :  { %v499_v30 = vmul.f32 %v1141_v31, %v476_v1 }
 0x10d   :  { %529 = vadd.xlane.f32.xlu0 %v499_v30 }
 0x176   :  { %v502_v14 = vpop.xlane.xlu1 %501 }
 0x177   :  { %v540_v51 = vadd.f32 %v1227_v12, %v502_v14 }
 0x179   :  { %v556_v40 = vsub.f32 0.0, %v540_v51 }
 0x17a   :  { %v508_v35 = vpop.xlane.xlu1 %507 }
 0x17b   :  { %v572_v41 = vmul.f32 1.442695, %v556_v40  ;;  %v543_v21 = vadd.f32 %v1227_v12, %v508_v35 }
 0x17d   :  { %786 = vpow2.f32 %v572_v41  ;;  %v559_v43 = vsub.f32 0.0, %v543_v21 }
 0x17e   :  { %v512_v15 = vpop.xlane.xlu1 %511  ;;  %v504_v19 = vpop.xlane.xlu0 %503 }
 0x17f   :  { %v578_v52 = vmul.f32 1.442695, %v559_v43  ;;  %v545_v22 = vadd.f32 %v1227_v12, %v512_v15  ;;  %v541_v31 = vadd.f32 %v1227_v12, %v504_v19 }
 0x181   :  { %788 = vpow2.f32 %v578_v52  ;;  %v561_v5 = vsub.f32 0.0, %v545_v22  ;;  %v557_v50 = vsub.f32 0.0, %v541_v31 }
 0x182   :  { %v516_v16 = vpop.xlane.xlu1 %515  ;;  %v506_v18 = vpop.xlane.xlu0 %505 }
 0x183   :  { %v582_v10 = vmul.f32 1.442695, %v561_v5  ;;  %v574_v38 = vmul.f32 1.442695, %v557_v50  ;;  %v547_v20 = vadd.f32 %v1227_v12, %v516_v16  ;;  %v542_v53 = vadd.f32 %v1227_v12, %v506_v18 }
 0x185   :  { %790 = vpow2.f32 %v582_v10  ;;  %v563_v33 = vsub.f32 0.0, %v547_v20  ;;  %v558_v24 = vsub.f32 0.0, %v542_v53 }
 0x186   :  { %792 = vpow2.f32 %v574_v38  ;;  %v520_v45 = vpop.xlane.xlu1 %519  ;;  %v510_v25 = vpop.xlane.xlu0 %509 }
 0x187   :  { %v787_v7 = vpop.eup %786  ;;  %v586_v28 = vmul.f32 1.442695, %v563_v33  ;;  %v576_v44 = vmul.f32 1.442695, %v558_v24  ;;  %v549_v29 = vadd.f32 %v1227_v12, %v520_v45  ;;  %v544_v34 = vadd.f32 %v1227_v12, %v510_v25 }
 0x188   :  { %v604_v57 = vadd.f32 1.0, %v787_v7 }
 0x189   :  { %794 = vpow2.f32 %v586_v28  ;;  %v565_v11 = vsub.f32 0.0, %v549_v29  ;;  %v560_v37 = vsub.f32 0.0, %v544_v34 }
 0x18a   :  { %796 = vrcp.f32 %v604_v57  ;;  %v524_v54 = vpop.xlane.xlu1 %523  ;;  %v514_v46 = vpop.xlane.xlu0 %513 }
 0x18b   :  { %v789_v23 = vpop.eup %788  ;;  %798 = vpow2.f32 %v576_v44  ;;  %v590_v59 = vmul.f32 1.442695, %v565_v11  ;;  %v580_v56 = vmul.f32 1.442695, %v560_v37  ;;  %v551_v48 = vadd.f32 %v1227_v12, %v524_v54 }
 0x18c   :  { %v607_v55 = vadd.f32 1.0, %v789_v23  ;;  %v546_v26 = vadd.f32 %v1227_v12, %v514_v46 }
 0x18d   :  { %800 = vpow2.f32 %v590_v59  ;;  %v567_v60 = vsub.f32 0.0, %v551_v48 }
 0x18e   :  { %802 = vrcp.f32 %v607_v55  ;;  %v562_v39 = vsub.f32 0.0, %v546_v26  ;;  %v528_v62 = vpop.xlane.xlu1 %527  ;;  %v518_v36 = vpop.xlane.xlu0 %517 }
 0x18f   :  { %v791_v0 = vpop.eup %790  ;;  %804 = vpow2.f32 %v580_v56  ;;  %v594_v17 = vmul.f32 1.442695, %v567_v60  ;;  %v553_v4 = vadd.f32 %v1227_v12, %v528_v62  ;;  %v548_v58 = vadd.f32 %v1227_v12, %v518_v36 }
 0x190   :  { %v793_v6 = vpop.eup %792  ;;  %v609_v13 = vadd.f32 1.0, %v791_v0  ;;  %v584_v49 = vmul.f32 1.442695, %v562_v39 }
 0x191   :  { %v605_v8 = vadd.f32 1.0, %v793_v6  ;;  %806 = vpow2.f32 %v594_v17  ;;  %v569_v63 = vsub.f32 0.0, %v553_v4  ;;  %v564_v42 = vsub.f32 0.0, %v548_v58 }
 0x192   :  { %808 = vrcp.f32 %v609_v13  ;;  %v532_v9 = vpop.xlane.xlu1 %531  ;;  %v522_v2 = vpop.xlane.xlu0 %521 }
 0x193   :  { %v795_v32 = vpop.eup %794  ;;  %810 = vrcp.f32 %v605_v8  ;;  %v598_v47 = vmul.f32 1.442695, %v569_v63  ;;  %v588_v27 = vmul.f32 1.442695, %v564_v42  ;;  %v555_v61 = vadd.f32 %v1227_v12, %v532_v9 }
 0x194   :  { %v797_v3 = vpop.eup %796  ;;  %v611_v1 = vadd.f32 1.0, %v795_v32  ;;  %812 = vpow2.f32 %v584_v49  ;;  %v550_v30 = vadd.f32 %v1227_v12, %v522_v2 }
 0x195   :  { %v799_v14 = vpop.eup %798  ;;  %814 = vpow2.f32 %v598_v47  ;;  %v571_v51 = vsub.f32 0.0, %v555_v61  ;;  %v669_v40 = vsub.f32 1.0, %v797_v3  ;;  %653 = vst.msk [vmem:[%s1394_s5] sm:$0xff] %vm652_vm0, %v797_v3 }
 0x196   :  { %816 = vrcp.f32 %v611_v1  ;;  %v606_v35 = vadd.f32 1.0, %v799_v14  ;;  %v566_v41 = vsub.f32 0.0, %v550_v30  ;;  %v526_v21 = vpop.xlane.xlu0 %525 }
 0x197   :  { %v801_v43 = vpop.eup %800  ;;  %818 = vpow2.f32 %v588_v27  ;;  %v602_v15 = vmul.f32 1.442695, %v571_v51  ;;  %v552_v19 = vadd.f32 %v1227_v12, %v526_v21  ;;  %701 = vrot.lane.b32.xlu0 %v669_v40, %s854_s30 }
 0x198   :  { %v803_v52 = vpop.eup %802  ;;  %820 = vrcp.f32 %v606_v35  ;;  %v613_v22 = vadd.f32 1.0, %v801_v43  ;;  %v592_v31 = vmul.f32 1.442695, %v566_v41 }
 0x199   :  { %v805_v5 = vpop.eup %804  ;;  %822 = vpow2.f32 %v602_v15  ;;  %v568_v50 = vsub.f32 0.0, %v552_v19  ;;  %v672_v16 = vsub.f32 1.0, %v803_v52  ;;  %656 = vst.msk [vmem:[%s1394_s5 + $0x18] sm:$0xff] %vm652_vm0, %v803_v52 }
 0x19a   :  { %824 = vrcp.f32 %v613_v22  ;;  %v608_v18 = vadd.f32 1.0, %v805_v5  ;;  %v530_v10 = vpop.xlane.xlu0 %529 }
 0x19b   :  { %v807_v38 = vpop.eup %806  ;;  %826 = vpow2.f32 %v592_v31  ;;  %v596_v20 = vmul.f32 1.442695, %v568_v50  ;;  %v554_v53 = vadd.f32 %v1227_v12, %v530_v10  ;;  %707 = vrot.lane.b32.xlu0 %v672_v16, %s854_s30 }
 0x19c   :  { %v809_v33 = vpop.eup %808  ;;  %828 = vrcp.f32 %v608_v18  ;;  %v615_v24 = vadd.f32 1.0, %v807_v38 }
 0x19d   :  { %v811_v45 = vpop.eup %810  ;;  %830 = vpow2.f32 %v596_v20  ;;  %v570_v25 = vsub.f32 0.0, %v554_v53  ;;  %v674_v7 = vsub.f32 1.0, %v809_v33  ;;  %658 = vst.msk [vmem:[%s1394_s5 + $0x28] sm:$0xff] %vm652_vm0, %v809_v33 }
 0x19e   :  { %v813_v28 = vpop.eup %812  ;;  %832 = vrcp.f32 %v615_v24  ;;  %v670_v44 = vsub.f32 1.0, %v811_v45  ;;  %654 = vst.msk [vmem:[%s1394_s5 + $0x8] sm:$0xff] %vm652_vm0, %v811_v45 }
 0x19f   :  { %v815_v12 = vpop.eup %814  ;;  %v610_v29 = vadd.f32 1.0, %v813_v28  ;;  %v600_v34 = vmul.f32 1.442695, %v570_v25  ;;  %711 = vrot.lane.b32.xlu0 %v674_v7, %s854_s30 }
 0x1a0   :  { %v817_v57 = vpop.eup %816  ;;  %v617_v11 = vadd.f32 1.0, %v815_v12  ;;  %703 = vrot.lane.b32.xlu1 %v670_v44, %s854_s30 }
 0x1a1   :  { %v819_v37 = vpop.eup %818  ;;  %834 = vrcp.f32 %v610_v29  ;;  %v676_v54 = vsub.f32 1.0, %v817_v57  ;;  %660 = vst.msk [vmem:[%s1394_s5 + $0x38] sm:$0xff] %vm652_vm0, %v817_v57 }
 0x1a2   :  { %v821_v46 = vpop.eup %820  ;;  %836 = vrcp.f32 %v617_v11  ;;  %v612_v23 = vadd.f32 1.0, %v819_v37 }
 0x1a3   :  { %v823_v59 = vpop.eup %822  ;;  %838 = vpow2.f32 %v600_v34  ;;  %715 = vrot.lane.b32.xlu0 %v676_v54, %s854_s30  ;;  %v671_v56 = vsub.f32 1.0, %v821_v46  ;;  %655 = vst.msk [vmem:[%s1394_s5 + $0x10] sm:$0xff] %vm652_vm0, %v821_v46 }
 0x1a4   :  { %v825_v48 = vpop.eup %824  ;;  %840 = vrcp.f32 %v612_v23  ;;  %v619_v55 = vadd.f32 1.0, %v823_v59 }
 0x1a5   :  { %v827_v26 = vpop.eup %826  ;;  %705 = vrot.lane.b32.xlu1 %v671_v56, %s854_s30  ;;  %v678_v60 = vsub.f32 1.0, %v825_v48  ;;  %662 = vst.msk [vmem:[%s1394_s5 + $0x48] sm:$0xff] %vm652_vm0, %v825_v48 }
 0x1a6   :  { %v829_v39 = vpop.eup %828  ;;  %842 = vrcp.f32 %v619_v55  ;;  %v614_v62 = vadd.f32 1.0, %v827_v26 }
 0x1a7   :  { %v831_v36 = vpop.eup %830  ;;  %719 = vrot.lane.b32.xlu0 %v678_v60, %s854_s30  ;;  %v673_v0 = vsub.f32 1.0, %v829_v39  ;;  %657 = vst.msk [vmem:[%s1394_s5 + $0x20] sm:$0xff] %vm652_vm0, %v829_v39 }
 0x1a8   :  { %v833_v17 = vpop.eup %832  ;;  %844 = vrcp.f32 %v614_v62  ;;  %v616_v4 = vadd.f32 1.0, %v831_v36 }
 0x1a9   :  { %709 = vrot.lane.b32.xlu1 %v673_v0, %s854_s30  ;;  %v680_v58 = vsub.f32 1.0, %v833_v17  ;;  %664 = vst.msk [vmem:[%s1394_s5 + $0x58] sm:$0xff] %vm652_vm0, %v833_v17 }
 0x1aa   :  { %846 = vrcp.f32 %v616_v4 }
 0x1ab   :  { %v835_v6 = vpop.eup %834  ;;  %723 = vrot.lane.b32.xlu0 %v680_v58, %s854_s30 }
 0x1ac   :  { %v837_v13 = vpop.eup %836  ;;  %v675_v49 = vsub.f32 1.0, %v835_v6  ;;  %659 = vst.msk [vmem:[%s1394_s5 + $0x30] sm:$0xff] %vm652_vm0, %v835_v6 }
 0x1ad   :  { %v839_v8 = vpop.eup %838  ;;  %v682_v63 = vsub.f32 1.0, %v837_v13  ;;  %666 = vst.msk [vmem:[%s1394_s5 + $0x68] sm:$0xff] %vm652_vm0, %v837_v13 }
 0x1ae   :  { %v841_v42 = vpop.eup %840  ;;  %v618_v9 = vadd.f32 1.0, %v839_v8  ;;  %713 = vrot.lane.b32.xlu1 %v675_v49, %s854_s30 }
 0x1af   :  { %727 = vrot.lane.b32.xlu0 %v682_v63, %s854_s30  ;;  %v677_v2 = vsub.f32 1.0, %v841_v42  ;;  %661 = vst.msk [vmem:[%s1394_s5 + $0x40] sm:$0xff] %vm652_vm0, %v841_v42 }
 0x1b0   :  { %v843_v32 = vpop.eup %842  ;;  %848 = vrcp.f32 %v618_v9 }
 0x1b1   :  { %v684_v47 = vsub.f32 1.0, %v843_v32  ;;  %668 = vst.msk [vmem:[%s1394_s5 + $0x78] sm:$0xff] %vm652_vm0, %v843_v32 }
 0x1b2   :  { %v845_v27 = vpop.eup %844  ;;  %717 = vrot.lane.b32.xlu1 %v677_v2, %s854_s30 }
 0x1b3   :  { %731 = vrot.lane.b32.xlu0 %v684_v47, %s854_s30  ;;  %v679_v61 = vsub.f32 1.0, %v845_v27  ;;  %663 = vst.msk [vmem:[%s1394_s5 + $0x50] sm:$0xff] %vm652_vm0, %v845_v27 }
 0x1b4   :  { %v847_v3 = vpop.eup %846 }
 0x1b5   :  { %665 = vst.msk [vmem:[%s1394_s5 + $0x60] sm:$0xff] %vm652_vm0, %v847_v3  ;;  %v681_v1 = vsub.f32 1.0, %v847_v3 }
 0x1b6   :  { %721 = vrot.lane.b32.xlu1 %v679_v61, %s854_s30 }
 0x1ba   :  { %v849_v30 = vpop.eup %848  ;;  %725 = vrot.lane.b32.xlu1 %v681_v1, %s854_s30 }
 0x1bb   :  { %v683_v14 = vsub.f32 1.0, %v849_v30  ;;  %667 = vst.msk [vmem:[%s1394_s5 + $0x70] sm:$0xff] %vm652_vm0, %v849_v30 }
 0x1be   :  { %729 = vrot.lane.b32.xlu1 %v683_v14, %s854_s30 }
 0x209   :  { %v702_v51 = vpop.permute.xlu0 %701 }
 0x20a   :  { %750 = vst.msk [vmem:[%s1394_s5] sm:$0xff] %vm749_vm1, %v702_v51 }
 0x20d   :  { %v708_v40 = vpop.permute.xlu0 %707 }
 0x20e   :  { %753 = vst.msk [vmem:[%s1394_s5 + $0x18] sm:$0xff] %vm749_vm1, %v708_v40 }
 0x211   :  { %v712_v35 = vpop.permute.xlu0 %711 }
 0x212   :  { %v704_v41 = vpop.permute.xlu1 %703  ;;  %755 = vst.msk [vmem:[%s1394_s5 + $0x28] sm:$0xff] %vm749_vm1, %v712_v35 }
 0x213   :  { %751 = vst.msk [vmem:[%s1394_s5 + $0x8] sm:$0xff] %vm749_vm1, %v704_v41 }
 0x215   :  { %v716_v21 = vpop.permute.xlu0 %715 }
 0x216   :  { %757 = vst.msk [vmem:[%s1394_s5 + $0x38] sm:$0xff] %vm749_vm1, %v716_v21 }
 0x217   :  { %v706_v43 = vpop.permute.xlu1 %705 }
 0x218   :  { %752 = vst.msk [vmem:[%s1394_s5 + $0x10] sm:$0xff] %vm749_vm1, %v706_v43 }
 0x219   :  { %v720_v15 = vpop.permute.xlu0 %719 }
 0x21a   :  { %759 = vst.msk [vmem:[%s1394_s5 + $0x48] sm:$0xff] %vm749_vm1, %v720_v15 }
 0x21b   :  { %v710_v19 = vpop.permute.xlu1 %709 }
 0x21c   :  { %754 = vst.msk [vmem:[%s1394_s5 + $0x20] sm:$0xff] %vm749_vm1, %v710_v19 }
 0x21d   :  { %v724_v52 = vpop.permute.xlu0 %723 }
 0x21e   :  { %761 = vst.msk [vmem:[%s1394_s5 + $0x58] sm:$0xff] %vm749_vm1, %v724_v52 }
 0x220   :  { %v714_v22 = vpop.permute.xlu1 %713 }
 0x221   :  { %756 = vst.msk [vmem:[%s1394_s5 + $0x30] sm:$0xff] %vm749_vm1, %v714_v22  ;;  %v728_v31 = vpop.permute.xlu0 %727 }
 0x222   :  { %763 = vst.msk [vmem:[%s1394_s5 + $0x68] sm:$0xff] %vm749_vm1, %v728_v31 }
 0x224   :  { %v718_v5 = vpop.permute.xlu1 %717 }
 0x225   :  { %758 = vst.msk [vmem:[%s1394_s5 + $0x40] sm:$0xff] %vm749_vm1, %v718_v5  ;;  %v732_v50 = vpop.permute.xlu0 %731 }
 0x226   :  { %765 = vst.msk [vmem:[%s1394_s5 + $0x78] sm:$0xff] %vm749_vm1, %v732_v50 }
 0x228   :  { %v722_v16 = vpop.permute.xlu1 %721 }
 0x229   :  { %760 = vst.msk [vmem:[%s1394_s5 + $0x50] sm:$0xff] %vm749_vm1, %v722_v16 }
 0x22c   :  { %v726_v18 = vpop.permute.xlu1 %725 }
 0x22d   :  { %762 = vst.msk [vmem:[%s1394_s5 + $0x60] sm:$0xff] %vm749_vm1, %v726_v18 }
 0x230   :  { %v730_v10 = vpop.permute.xlu1 %729 }
 0x231   :  { %764 = vst.msk [vmem:[%s1394_s5 + $0x70] sm:$0xff] %vm749_vm1, %v730_v10 }

</bundles_post_ra>
